<compile_context>
chip_gen: v7x
topology: tpu7x:2x2x1
jax: 0.10.0
libtpu: 0.0.40
codegen_flags: <defaults>
</compile_context>

<pallas_src>
import functools

import jax
import jax.numpy as jnp
from jax import lax
from jax.experimental import pallas as pl
from jax.experimental.pallas import tpu as pltpu


# ----------------------------------------------------------------------------
# Fused forward kernel (everything in VMEM, single invocation, no grid)
# ----------------------------------------------------------------------------
def _our_net_kernel(
    patches_ref, text_ref,
    ve_w_ref, ve_b_ref, te_w_ref, te_b_ref,
    vt_w_ref, vt_b_ref, tt_w_ref, tt_b_ref,
    ca_wq_ref, ca_bq_ref, ca_wkv_ref, ca_bkv_ref, ca_wo_ref, ca_bo_ref,
    sa_wqkv_ref, sa_bqkv_ref, sa_wo_ref, sa_bo_ref,
    cl_w_ref, cl_b_ref,
    out_ref,
    *, B, Sv, St, D, scale):
    f32 = jnp.float32

    def mm(x, w_ref, b_ref):
        # out = x @ w + b with fp32 accumulation on the MXU.
        return jnp.dot(x, w_ref[...], preferred_element_type=f32) + b_ref[...]

    def attend(q2, kv2, Sq, Sk):
        # q2: (B*Sq, D); kv2: (B*Sk, 2D) with K|V concatenated on the lane axis.
        q = q2.reshape(B, Sq, D)
        k = kv2[:, :D].reshape(B, Sk, D)
        v = kv2[:, D:2 * D].reshape(B, Sk, D)
        # scores: contract over D directly (no transpose materialized).
        s = lax.dot_general(
            q, k, dimension_numbers=(((2,), (2,)), ((0,), (0,))),
            preferred_element_type=f32) * scale                 # (B, Sq, Sk)
        s = s - jnp.max(s, axis=-1, keepdims=True)
        p = jnp.exp(s)
        p = p * pl.reciprocal(jnp.sum(p, axis=-1, keepdims=True), approx=True)
        o = lax.dot_general(
            p, v, dimension_numbers=(((2,), (1,)), ((0,), (0,))),
            preferred_element_type=f32)                          # (B, Sq, D)
        return o.reshape(B * Sq, D)

    # --- encoders -----------------------------------------------------------
    vf = mm(patches_ref[...], ve_w_ref, ve_b_ref)       # (B*Sv, D)
    tf = mm(text_ref[...], te_w_ref, te_b_ref)          # (B*St, D)

    # --- trt projection heads (+ GELU) --------------------------------------
    vf = jax.nn.gelu(mm(vf, vt_w_ref, vt_b_ref))
    tf = jax.nn.gelu(mm(tf, tt_w_ref, tt_b_ref))

    # --- cross-attention: Q = text, K/V = vision (fused K|V matmul) ----------
    q = mm(tf, ca_wq_ref, ca_bq_ref)                    # (B*St, D)
    kv = mm(vf, ca_wkv_ref, ca_bkv_ref)                 # (B*Sv, 2D)
    cross = attend(q, kv, St, Sv)                       # (B*St, D)
    cross = mm(cross, ca_wo_ref, ca_bo_ref)

    # --- self-attention on the cross feature (fused Q|K|V matmul) ------------
    qkv = mm(cross, sa_wqkv_ref, sa_bqkv_ref)           # (B*St, 3D)
    sa = attend(qkv[:, :D], qkv[:, D:3 * D], St, St)
    feat = mm(sa, sa_wo_ref, sa_bo_ref)                 # (B*St, D)

    # --- classifier: mean-pool over sequence + linear -------------------------
    pooled = jnp.mean(feat.reshape(B, St, D), axis=1)   # (B, D)
    out = jnp.dot(pooled, cl_w_ref[...], preferred_element_type=f32) + cl_b_ref[...]
    out_ref[...] = out.astype(out_ref.dtype)            # only HBM store: (B, NC)


# ----------------------------------------------------------------------------
# Parameter construction (deterministic synthetic weights, fused QKV layouts)
# ----------------------------------------------------------------------------
def make_params(key, c_in, patch, text_dim, hidden, num_classes):
    keys = jax.random.split(key, 16)
    sc = 0.05

    def w(k, shape):
        return (sc * jax.random.normal(k, shape)).astype(jnp.float32)

    def b(n):
        return jnp.zeros((1, n), jnp.float32)

    return {
        # vision encoder: patch-embed conv as matmul over unfolded patches
        "ve_w": w(keys[0], (c_in * patch * patch, hidden)), "ve_b": b(hidden),
        # text encoder
        "te_w": w(keys[1], (text_dim, hidden)), "te_b": b(hidden),
        # vision / text "trt" projection heads
        "vt_w": w(keys[2], (hidden, hidden)), "vt_b": b(hidden),
        "tt_w": w(keys[3], (hidden, hidden)), "tt_b": b(hidden),
        # cross attention: Q (from text) separate, K|V (from vision) fused
        "ca_wq": w(keys[4], (hidden, hidden)), "ca_bq": b(hidden),
        "ca_wkv": w(keys[5], (hidden, 2 * hidden)), "ca_bkv": b(2 * hidden),
        "ca_wo": w(keys[6], (hidden, hidden)), "ca_bo": b(hidden),
        # self attention: fused Q|K|V
        "sa_wqkv": w(keys[7], (hidden, 3 * hidden)), "sa_bqkv": b(3 * hidden),
        "sa_wo": w(keys[8], (hidden, hidden)), "sa_bo": b(hidden),
        # classifier
        "cl_w": w(keys[9], (hidden, num_classes)), "cl_b": b(num_classes),
    }


# ----------------------------------------------------------------------------
# Forward pass (mirrors Our_Net.forward) — one fused pallas_call
# ----------------------------------------------------------------------------
def our_net_forward(params, vision, text, *, patch):
    B, C, H, W = vision.shape
    hp, wp = H // patch, W // patch
    Sv = hp * wp
    _, St, E = text.shape
    D = params["ve_w"].shape[1]
    NC = params["cl_w"].shape[1]

    # Layout glue (done once, outside the kernel): unfold NCHW into patch rows.
    patches = vision.reshape(B, C, hp, patch, wp, patch)
    patches = jnp.transpose(patches, (0, 2, 4, 1, 3, 5))
    patches = patches.reshape(B * Sv, C * patch * patch)
    text_flat = text.reshape(B * St, E)

    kernel = functools.partial(
        _our_net_kernel, B=B, Sv=Sv, St=St, D=D, scale=1.0 / (D ** 0.5))

    args = (
        patches, text_flat,
        params["ve_w"], params["ve_b"], params["te_w"], params["te_b"],
        params["vt_w"], params["vt_b"], params["tt_w"], params["tt_b"],
        params["ca_wq"], params["ca_bq"], params["ca_wkv"], params["ca_bkv"],
        params["ca_wo"], params["ca_bo"],
        params["sa_wqkv"], params["sa_bqkv"], params["sa_wo"], params["sa_bo"],
        params["cl_w"], params["cl_b"],
    )
    vmem_spec = pl.BlockSpec(memory_space=pltpu.MemorySpace.VMEM)

    return pl.pallas_call(
        kernel,
        out_shape=jax.ShapeDtypeStruct((B, NC), jnp.float32),
        in_specs=[vmem_spec] * len(args),
        out_specs=pl.BlockSpec(memory_space=pltpu.MemorySpace.VMEM),
    )(*args)


# TODO(synk): exact sub-module architectures (text_encoder / vision_encoder /
# *_trt / attention / classifier) are not recoverable from the .pth-loading
# __init__; this is a faithful minimal reconstruction of the dataflow.


if __name__ == "__main__":
    B, C, H, W = 2, 4, 16, 16       # vision: NCHW
    St, E = 8, 16                   # text: (B, seq, embed)
    PATCH = 4
    HIDDEN = 32
    NUM_CLASSES = 4

    root = jax.random.PRNGKey(0)
    k_v, k_t, k_p = jax.random.split(root, 3)
    vision = jax.random.normal(k_v, (B, C, H, W), dtype=jnp.float32)
    text = jax.random.normal(k_t, (B, St, E), dtype=jnp.float32)
    params = make_params(k_p, C, PATCH, E, HIDDEN, NUM_CLASSES)

    out = our_net_forward(params, vision, text, patch=PATCH)
    out = jax.block_until_ready(out)
    assert out.shape == (B, NUM_CLASSES), out.shape
    assert bool(jnp.all(jnp.isfinite(out)))
    print("KERNEL_OK")
</pallas_src>

<mosaic_0001>
module attributes {stable_mosaic.version = 11 : i64} {
  func.func @_our_net_kernel(%arg0: memref<32x64xf32, #tpu.memory_space<vmem>>, %arg1: memref<16x16xf32, #tpu.memory_space<vmem>>, %arg2: memref<64x32xf32, #tpu.memory_space<vmem>>, %arg3: memref<1x32xf32, #tpu.memory_space<vmem>>, %arg4: memref<16x32xf32, #tpu.memory_space<vmem>>, %arg5: memref<1x32xf32, #tpu.memory_space<vmem>>, %arg6: memref<32x32xf32, #tpu.memory_space<vmem>>, %arg7: memref<1x32xf32, #tpu.memory_space<vmem>>, %arg8: memref<32x32xf32, #tpu.memory_space<vmem>>, %arg9: memref<1x32xf32, #tpu.memory_space<vmem>>, %arg10: memref<32x32xf32, #tpu.memory_space<vmem>>, %arg11: memref<1x32xf32, #tpu.memory_space<vmem>>, %arg12: memref<32x64xf32, #tpu.memory_space<vmem>>, %arg13: memref<1x64xf32, #tpu.memory_space<vmem>>, %arg14: memref<32x32xf32, #tpu.memory_space<vmem>>, %arg15: memref<1x32xf32, #tpu.memory_space<vmem>>, %arg16: memref<32x96xf32, #tpu.memory_space<vmem>>, %arg17: memref<1x96xf32, #tpu.memory_space<vmem>>, %arg18: memref<32x32xf32, #tpu.memory_space<vmem>>, %arg19: memref<1x32xf32, #tpu.memory_space<vmem>>, %arg20: memref<32x4xf32, #tpu.memory_space<vmem>>, %arg21: memref<1x4xf32, #tpu.memory_space<vmem>>, %arg22: memref<2x4xf32, #tpu.memory_space<vmem>>) attributes {dimension_semantics = [], scalar_prefetch = 0 : i64, scratch_operands = 0 : i64, tpu.core_type = #tpu.core_type<tc>} {
    %c0 = arith.constant 0 : index
    %c0_0 = arith.constant 0 : index
    %0 = vector.load %arg0[%c0, %c0_0] : memref<32x64xf32, #tpu.memory_space<vmem>>, vector<32x64xf32>
    %c0_1 = arith.constant 0 : index
    %c0_2 = arith.constant 0 : index
    %1 = vector.load %arg2[%c0_1, %c0_2] : memref<64x32xf32, #tpu.memory_space<vmem>>, vector<64x32xf32>
    %cst = arith.constant dense<0.000000e+00> : vector<32x32xf32>
    %2 = tpu.matmul %0, %1, %cst {dimension_numbers = #tpu.dot_dimension_numbers<[1], [0], [0], [1], [0, 0, 1, 1], [], []>} : vector<32x64xf32>, vector<64x32xf32>, vector<32x32xf32> -> vector<32x32xf32>
    %c0_3 = arith.constant 0 : index
    %c0_4 = arith.constant 0 : index
    %3 = vector.load %arg3[%c0_3, %c0_4] : memref<1x32xf32, #tpu.memory_space<vmem>>, vector<1x32xf32>
    %4 = vector.broadcast %3 : vector<1x32xf32> to vector<32x32xf32>
    %5 = arith.addf %2, %4 : vector<32x32xf32>
    %c0_5 = arith.constant 0 : index
    %c0_6 = arith.constant 0 : index
    %6 = vector.load %arg1[%c0_5, %c0_6] : memref<16x16xf32, #tpu.memory_space<vmem>>, vector<16x16xf32>
    %c0_7 = arith.constant 0 : index
    %c0_8 = arith.constant 0 : index
    %7 = vector.load %arg4[%c0_7, %c0_8] : memref<16x32xf32, #tpu.memory_space<vmem>>, vector<16x32xf32>
    %cst_9 = arith.constant dense<0.000000e+00> : vector<16x32xf32>
    %8 = tpu.matmul %6, %7, %cst_9 {dimension_numbers = #tpu.dot_dimension_numbers<[1], [0], [0], [1], [0, 0, 1, 1], [], []>} : vector<16x16xf32>, vector<16x32xf32>, vector<16x32xf32> -> vector<16x32xf32>
    %c0_10 = arith.constant 0 : index
    %c0_11 = arith.constant 0 : index
    %9 = vector.load %arg5[%c0_10, %c0_11] : memref<1x32xf32, #tpu.memory_space<vmem>>, vector<1x32xf32>
    %10 = vector.broadcast %9 : vector<1x32xf32> to vector<16x32xf32>
    %11 = arith.addf %8, %10 : vector<16x32xf32>
    %c0_12 = arith.constant 0 : index
    %c0_13 = arith.constant 0 : index
    %12 = vector.load %arg6[%c0_12, %c0_13] : memref<32x32xf32, #tpu.memory_space<vmem>>, vector<32x32xf32>
    %cst_14 = arith.constant dense<0.000000e+00> : vector<32x32xf32>
    %13 = tpu.matmul %5, %12, %cst_14 {dimension_numbers = #tpu.dot_dimension_numbers<[1], [0], [0], [1], [0, 0, 1, 1], [], []>} : vector<32x32xf32>, vector<32x32xf32>, vector<32x32xf32> -> vector<32x32xf32>
    %c0_15 = arith.constant 0 : index
    %c0_16 = arith.constant 0 : index
    %14 = vector.load %arg7[%c0_15, %c0_16] : memref<1x32xf32, #tpu.memory_space<vmem>>, vector<1x32xf32>
    %15 = vector.broadcast %14 : vector<1x32xf32> to vector<32x32xf32>
    %16 = arith.addf %13, %15 : vector<32x32xf32>
    %17 = arith.mulf %16, %16 : vector<32x32xf32>
    %18 = arith.mulf %16, %17 : vector<32x32xf32>
    %cst_17 = arith.constant 4.471500e-02 : f32
    %19 = vector.broadcast %cst_17 : f32 to vector<32x32xf32>
    %20 = arith.mulf %19, %18 : vector<32x32xf32>
    %21 = arith.addf %16, %20 : vector<32x32xf32>
    %cst_18 = arith.constant 0.797884583 : f32
    %22 = vector.broadcast %cst_18 : f32 to vector<32x32xf32>
    %23 = arith.mulf %22, %21 : vector<32x32xf32>
    %24 = math.tanh %23 : vector<32x32xf32>
    %cst_19 = arith.constant 1.000000e+00 : f32
    %25 = vector.broadcast %cst_19 : f32 to vector<32x32xf32>
    %26 = arith.addf %25, %24 : vector<32x32xf32>
    %cst_20 = arith.constant 5.000000e-01 : f32
    %27 = vector.broadcast %cst_20 : f32 to vector<32x32xf32>
    %28 = arith.mulf %27, %26 : vector<32x32xf32>
    %29 = arith.mulf %16, %28 : vector<32x32xf32>
    %c0_21 = arith.constant 0 : index
    %c0_22 = arith.constant 0 : index
    %30 = vector.load %arg8[%c0_21, %c0_22] : memref<32x32xf32, #tpu.memory_space<vmem>>, vector<32x32xf32>
    %cst_23 = arith.constant dense<0.000000e+00> : vector<16x32xf32>
    %31 = tpu.matmul %11, %30, %cst_23 {dimension_numbers = #tpu.dot_dimension_numbers<[1], [0], [0], [1], [0, 0, 1, 1], [], []>} : vector<16x32xf32>, vector<32x32xf32>, vector<16x32xf32> -> vector<16x32xf32>
    %c0_24 = arith.constant 0 : index
    %c0_25 = arith.constant 0 : index
    %32 = vector.load %arg9[%c0_24, %c0_25] : memref<1x32xf32, #tpu.memory_space<vmem>>, vector<1x32xf32>
    %33 = vector.broadcast %32 : vector<1x32xf32> to vector<16x32xf32>
    %34 = arith.addf %31, %33 : vector<16x32xf32>
    %35 = arith.mulf %34, %34 : vector<16x32xf32>
    %36 = arith.mulf %34, %35 : vector<16x32xf32>
    %cst_26 = arith.constant 4.471500e-02 : f32
    %37 = vector.broadcast %cst_26 : f32 to vector<16x32xf32>
    %38 = arith.mulf %37, %36 : vector<16x32xf32>
    %39 = arith.addf %34, %38 : vector<16x32xf32>
    %cst_27 = arith.constant 0.797884583 : f32
    %40 = vector.broadcast %cst_27 : f32 to vector<16x32xf32>
    %41 = arith.mulf %40, %39 : vector<16x32xf32>
    %42 = math.tanh %41 : vector<16x32xf32>
    %cst_28 = arith.constant 1.000000e+00 : f32
    %43 = vector.broadcast %cst_28 : f32 to vector<16x32xf32>
    %44 = arith.addf %43, %42 : vector<16x32xf32>
    %cst_29 = arith.constant 5.000000e-01 : f32
    %45 = vector.broadcast %cst_29 : f32 to vector<16x32xf32>
    %46 = arith.mulf %45, %44 : vector<16x32xf32>
    %47 = arith.mulf %34, %46 : vector<16x32xf32>
    %c0_30 = arith.constant 0 : index
    %c0_31 = arith.constant 0 : index
    %48 = vector.load %arg10[%c0_30, %c0_31] : memref<32x32xf32, #tpu.memory_space<vmem>>, vector<32x32xf32>
    %cst_32 = arith.constant dense<0.000000e+00> : vector<16x32xf32>
    %49 = tpu.matmul %47, %48, %cst_32 {dimension_numbers = #tpu.dot_dimension_numbers<[1], [0], [0], [1], [0, 0, 1, 1], [], []>} : vector<16x32xf32>, vector<32x32xf32>, vector<16x32xf32> -> vector<16x32xf32>
    %c0_33 = arith.constant 0 : index
    %c0_34 = arith.constant 0 : index
    %50 = vector.load %arg11[%c0_33, %c0_34] : memref<1x32xf32, #tpu.memory_space<vmem>>, vector<1x32xf32>
    %51 = vector.broadcast %50 : vector<1x32xf32> to vector<16x32xf32>
    %52 = arith.addf %49, %51 : vector<16x32xf32>
    %c0_35 = arith.constant 0 : index
    %c0_36 = arith.constant 0 : index
    %53 = vector.load %arg12[%c0_35, %c0_36] : memref<32x64xf32, #tpu.memory_space<vmem>>, vector<32x64xf32>
    %cst_37 = arith.constant dense<0.000000e+00> : vector<32x64xf32>
    %54 = tpu.matmul %29, %53, %cst_37 {dimension_numbers = #tpu.dot_dimension_numbers<[1], [0], [0], [1], [0, 0, 1, 1], [], []>} : vector<32x32xf32>, vector<32x64xf32>, vector<32x64xf32> -> vector<32x64xf32>
    %c0_38 = arith.constant 0 : index
    %c0_39 = arith.constant 0 : index
    %55 = vector.load %arg13[%c0_38, %c0_39] : memref<1x64xf32, #tpu.memory_space<vmem>>, vector<1x64xf32>
    %56 = vector.broadcast %55 : vector<1x64xf32> to vector<32x64xf32>
    %57 = arith.addf %54, %56 : vector<32x64xf32>
    %58 = vector.shape_cast %52 : vector<16x32xf32> to vector<2x8x32xf32>
    %59 = vector.extract_strided_slice %57 {offsets = [0, 0], sizes = [32, 32], strides = [1, 1]} : vector<32x64xf32> to vector<32x32xf32>
    %60 = vector.shape_cast %59 : vector<32x32xf32> to vector<2x16x32xf32>
    %61 = vector.extract_strided_slice %57 {offsets = [0, 32], sizes = [32, 32], strides = [1, 1]} : vector<32x64xf32> to vector<32x32xf32>
    %62 = vector.shape_cast %61 : vector<32x32xf32> to vector<2x16x32xf32>
    %cst_40 = arith.constant dense<0.000000e+00> : vector<2x8x16xf32>
    %63 = tpu.matmul %58, %60, %cst_40 {dimension_numbers = #tpu.dot_dimension_numbers<[2], [2], [1], [1], [0, 0, 0, 1, 1, 1], [0], [0]>} : vector<2x8x32xf32>, vector<2x16x32xf32>, vector<2x8x16xf32> -> vector<2x8x16xf32>
    %cst_41 = arith.constant 0.176776692 : f32
    %64 = vector.broadcast %cst_41 : f32 to vector<2x8x16xf32>
    %65 = arith.mulf %63, %64 : vector<2x8x16xf32>
    %cst_42 = arith.constant dense<0xFF800000> : vector<2x8xf32>
    %66 = vector.multi_reduction <maximumf>, %65, %cst_42 [2] : vector<2x8x16xf32> to vector<2x8xf32>
    %67 = vector.shape_cast %66 : vector<2x8xf32> to vector<2x8x1xf32>
    %68 = vector.broadcast %67 : vector<2x8x1xf32> to vector<2x8x16xf32>
    %69 = arith.subf %65, %68 : vector<2x8x16xf32>
    %70 = math.exp %69 : vector<2x8x16xf32>
    %cst_43 = arith.constant dense<0.000000e+00> : vector<2x8xf32>
    %71 = vector.multi_reduction <add>, %70, %cst_43 [2] : vector<2x8x16xf32> to vector<2x8xf32>
    %72 = vector.shape_cast %71 : vector<2x8xf32> to vector<2x8x1xf32>
    %73 = tpu.reciprocal %72 {approx = true} : vector<2x8x1xf32> -> vector<2x8x1xf32>
    %74 = vector.broadcast %73 : vector<2x8x1xf32> to vector<2x8x16xf32>
    %75 = arith.mulf %70, %74 : vector<2x8x16xf32>
    %cst_44 = arith.constant dense<0.000000e+00> : vector<2x8x32xf32>
    %76 = tpu.matmul %75, %62, %cst_44 {dimension_numbers = #tpu.dot_dimension_numbers<[2], [1], [1], [2], [0, 0, 0, 1, 1, 2], [0], [0]>} : vector<2x8x16xf32>, vector<2x16x32xf32>, vector<2x8x32xf32> -> vector<2x8x32xf32>
    %77 = vector.shape_cast %76 : vector<2x8x32xf32> to vector<16x32xf32>
    %c0_45 = arith.constant 0 : index
    %c0_46 = arith.constant 0 : index
    %78 = vector.load %arg14[%c0_45, %c0_46] : memref<32x32xf32, #tpu.memory_space<vmem>>, vector<32x32xf32>
    %cst_47 = arith.constant dense<0.000000e+00> : vector<16x32xf32>
    %79 = tpu.matmul %77, %78, %cst_47 {dimension_numbers = #tpu.dot_dimension_numbers<[1], [0], [0], [1], [0, 0, 1, 1], [], []>} : vector<16x32xf32>, vector<32x32xf32>, vector<16x32xf32> -> vector<16x32xf32>
    %c0_48 = arith.constant 0 : index
    %c0_49 = arith.constant 0 : index
    %80 = vector.load %arg15[%c0_48, %c0_49] : memref<1x32xf32, #tpu.memory_space<vmem>>, vector<1x32xf32>
    %81 = vector.broadcast %80 : vector<1x32xf32> to vector<16x32xf32>
    %82 = arith.addf %79, %81 : vector<16x32xf32>
    %c0_50 = arith.constant 0 : index
    %c0_51 = arith.constant 0 : index
    %83 = vector.load %arg16[%c0_50, %c0_51] : memref<32x96xf32, #tpu.memory_space<vmem>>, vector<32x96xf32>
    %cst_52 = arith.constant dense<0.000000e+00> : vector<16x96xf32>
    %84 = tpu.matmul %82, %83, %cst_52 {dimension_numbers = #tpu.dot_dimension_numbers<[1], [0], [0], [1], [0, 0, 1, 1], [], []>} : vector<16x32xf32>, vector<32x96xf32>, vector<16x96xf32> -> vector<16x96xf32>
    %c0_53 = arith.constant 0 : index
    %c0_54 = arith.constant 0 : index
    %85 = vector.load %arg17[%c0_53, %c0_54] : memref<1x96xf32, #tpu.memory_space<vmem>>, vector<1x96xf32>
    %86 = vector.broadcast %85 : vector<1x96xf32> to vector<16x96xf32>
    %87 = arith.addf %84, %86 : vector<16x96xf32>
    %88 = vector.extract_strided_slice %87 {offsets = [0, 0], sizes = [16, 32], strides = [1, 1]} : vector<16x96xf32> to vector<16x32xf32>
    %89 = vector.extract_strided_slice %87 {offsets = [0, 32], sizes = [16, 64], strides = [1, 1]} : vector<16x96xf32> to vector<16x64xf32>
    %90 = vector.shape_cast %88 : vector<16x32xf32> to vector<2x8x32xf32>
    %91 = vector.extract_strided_slice %89 {offsets = [0, 0], sizes = [16, 32], strides = [1, 1]} : vector<16x64xf32> to vector<16x32xf32>
    %92 = vector.shape_cast %91 : vector<16x32xf32> to vector<2x8x32xf32>
    %93 = vector.extract_strided_slice %89 {offsets = [0, 32], sizes = [16, 32], strides = [1, 1]} : vector<16x64xf32> to vector<16x32xf32>
    %94 = vector.shape_cast %93 : vector<16x32xf32> to vector<2x8x32xf32>
    %cst_55 = arith.constant dense<0.000000e+00> : vector<2x8x8xf32>
    %95 = tpu.matmul %90, %92, %cst_55 {dimension_numbers = #tpu.dot_dimension_numbers<[2], [2], [1], [1], [0, 0, 0, 1, 1, 1], [0], [0]>} : vector<2x8x32xf32>, vector<2x8x32xf32>, vector<2x8x8xf32> -> vector<2x8x8xf32>
    %cst_56 = arith.constant 0.176776692 : f32
    %96 = vector.broadcast %cst_56 : f32 to vector<2x8x8xf32>
    %97 = arith.mulf %95, %96 : vector<2x8x8xf32>
    %cst_57 = arith.constant dense<0xFF800000> : vector<2x8xf32>
    %98 = vector.multi_reduction <maximumf>, %97, %cst_57 [2] : vector<2x8x8xf32> to vector<2x8xf32>
    %99 = vector.shape_cast %98 : vector<2x8xf32> to vector<2x8x1xf32>
    %100 = vector.broadcast %99 : vector<2x8x1xf32> to vector<2x8x8xf32>
    %101 = arith.subf %97, %100 : vector<2x8x8xf32>
    %102 = math.exp %101 : vector<2x8x8xf32>
    %cst_58 = arith.constant dense<0.000000e+00> : vector<2x8xf32>
    %103 = vector.multi_reduction <add>, %102, %cst_58 [2] : vector<2x8x8xf32> to vector<2x8xf32>
    %104 = vector.shape_cast %103 : vector<2x8xf32> to vector<2x8x1xf32>
    %105 = tpu.reciprocal %104 {approx = true} : vector<2x8x1xf32> -> vector<2x8x1xf32>
    %106 = vector.broadcast %105 : vector<2x8x1xf32> to vector<2x8x8xf32>
    %107 = arith.mulf %102, %106 : vector<2x8x8xf32>
    %cst_59 = arith.constant dense<0.000000e+00> : vector<2x8x32xf32>
    %108 = tpu.matmul %107, %94, %cst_59 {dimension_numbers = #tpu.dot_dimension_numbers<[2], [1], [1], [2], [0, 0, 0, 1, 1, 2], [0], [0]>} : vector<2x8x8xf32>, vector<2x8x32xf32>, vector<2x8x32xf32> -> vector<2x8x32xf32>
    %109 = vector.shape_cast %108 : vector<2x8x32xf32> to vector<16x32xf32>
    %c0_60 = arith.constant 0 : index
    %c0_61 = arith.constant 0 : index
    %110 = vector.load %arg18[%c0_60, %c0_61] : memref<32x32xf32, #tpu.memory_space<vmem>>, vector<32x32xf32>
    %cst_62 = arith.constant dense<0.000000e+00> : vector<16x32xf32>
    %111 = tpu.matmul %109, %110, %cst_62 {dimension_numbers = #tpu.dot_dimension_numbers<[1], [0], [0], [1], [0, 0, 1, 1], [], []>} : vector<16x32xf32>, vector<32x32xf32>, vector<16x32xf32> -> vector<16x32xf32>
    %c0_63 = arith.constant 0 : index
    %c0_64 = arith.constant 0 : index
    %112 = vector.load %arg19[%c0_63, %c0_64] : memref<1x32xf32, #tpu.memory_space<vmem>>, vector<1x32xf32>
    %113 = vector.broadcast %112 : vector<1x32xf32> to vector<16x32xf32>
    %114 = arith.addf %111, %113 : vector<16x32xf32>
    %115 = vector.shape_cast %114 : vector<16x32xf32> to vector<2x8x32xf32>
    %cst_65 = arith.constant dense<0.000000e+00> : vector<2x32xf32>
    %116 = vector.multi_reduction <add>, %115, %cst_65 [1] : vector<2x8x32xf32> to vector<2x32xf32>
    %cst_66 = arith.constant 8.000000e+00 : f32
    %117 = vector.broadcast %cst_66 : f32 to vector<2x32xf32>
    %118 = arith.divf %116, %117 : vector<2x32xf32>
    %c0_67 = arith.constant 0 : index
    %c0_68 = arith.constant 0 : index
    %119 = vector.load %arg20[%c0_67, %c0_68] : memref<32x4xf32, #tpu.memory_space<vmem>>, vector<32x4xf32>
    %cst_69 = arith.constant dense<0.000000e+00> : vector<2x4xf32>
    %120 = tpu.matmul %118, %119, %cst_69 {dimension_numbers = #tpu.dot_dimension_numbers<[1], [0], [0], [1], [0, 0, 1, 1], [], []>} : vector<2x32xf32>, vector<32x4xf32>, vector<2x4xf32> -> vector<2x4xf32>
    %c0_70 = arith.constant 0 : index
    %c0_71 = arith.constant 0 : index
    %121 = vector.load %arg21[%c0_70, %c0_71] : memref<1x4xf32, #tpu.memory_space<vmem>>, vector<1x4xf32>
    %122 = vector.broadcast %121 : vector<1x4xf32> to vector<2x4xf32>
    %123 = arith.addf %120, %122 : vector<2x4xf32>
    %c0_72 = arith.constant 0 : index
    %c0_73 = arith.constant 0 : index
    %124 = vector.load %arg22[%c0_72, %c0_73] : memref<2x4xf32, #tpu.memory_space<vmem>>, vector<2x4xf32>
    tpu.vector_store %arg22[%c0_72, %c0_73], %123 {strides = array<i32>} : memref<2x4xf32, #tpu.memory_space<vmem>>, vector<2x4xf32>,
    return
  }
}

</mosaic_0001>

<bundles_post_ra>
// kernel: tpu_custom_call.1
= control target key start
LH: loop header
LB: loop body
LE: loop exit
PB: predicated region body
PF: predicated region fallthrough
CT: control target
= control target key end

     0   :  { %s3264_s0 = inlined_call_operand.vmem [shape: f32[32,64], index: 0, kind: input, shape index: {}]   ;;  %s3265_s1 = inlined_call_operand.hbm [shape: f32[16,16], index: 1, kind: input, shape index: {}]   ;;  %s3266_s2 = inlined_call_operand.vmem [shape: f32[64,32], index: 2, kind: input, shape index: {}]   ;;  %s3267_s3 = inlined_call_operand.hbm [shape: f32[1,32], index: 3, kind: input, shape index: {}]   ;;  %s3268_s4 = inlined_call_operand.hbm [shape: f32[16,32], index: 4, kind: input, shape index: {}]   ;;  %s3269_s5 = inlined_call_operand.hbm [shape: f32[1,32], index: 5, kind: input, shape index: {}]   ;;  %s3270_s6 = inlined_call_operand.vmem [shape: f32[32,32], index: 6, kind: input, shape index: {}]   ;;  %s3271_s7 = inlined_call_operand.hbm [shape: f32[1,32], index: 7, kind: input, shape index: {}]   ;;  %s3272_s8 = inlined_call_operand.vmem [shape: f32[32,32], index: 8, kind: input, shape index: {}]   ;;  %s3273_s9 = inlined_call_operand.hbm [shape: f32[1,32], index: 9, kind: input, shape index: {}]   ;;  %s3274_s10 = inlined_call_operand.vmem [shape: f32[32,32], index: 10, kind: input, shape index: {}]   ;;  %s3275_s11 = inlined_call_operand.hbm [shape: f32[1,32], index: 11, kind: input, shape index: {}]   ;;  %s3276_s12 = inlined_call_operand.hbm [shape: f32[32,64], index: 12, kind: input, shape index: {}]   ;;  %s3277_s13 = inlined_call_operand.hbm [shape: f32[1,64], index: 13, kind: input, shape index: {}]   ;;  %s3278_s14 = inlined_call_operand.hbm [shape: f32[32,32], index: 14, kind: input, shape index: {}]   ;;  %s3279_s15 = inlined_call_operand.hbm [shape: f32[1,32], index: 15, kind: input, shape index: {}]   ;;  %s3280_s16 = inlined_call_operand.vmem [shape: f32[32,96], index: 16, kind: input, shape index: {}]   ;;  %s3281_s17 = inlined_call_operand.hbm [shape: f32[1,96], index: 17, kind: input, shape index: {}]   ;;  %s3282_s18 = inlined_call_operand.hbm [shape: f32[32,32], index: 18, kind: input, shape index: {}]   ;;  %s3283_s19 = inlined_call_operand.vmem [shape: f32[1,32], index: 19, kind: input, shape index: {}]   ;;  %s3284_s20 = inlined_call_operand.vmem [shape: f32[32,4], index: 20, kind: input, shape index: {}]   ;;  %s3285_s21 = inlined_call_operand.vmem [shape: f32[1,4], index: 21, kind: input, shape index: {}]   ;;  %s3286_s22 = inlined_call_operand.hbm [shape: f32[2,4], index: 22, kind: output, shape index: {}]  }
   0x1   :  { %3294 = sst [smem:[#allocation32_spill]] %s3264_s0 }
   0x2   :  { %3295 = sst [smem:[#allocation33_spill]] %s3265_s1 }
   0x3   :  { %3296 = sst [smem:[#allocation34_spill]] %s3266_s2 }
   0x4   :  { %3297 = sst [smem:[#allocation35_spill]] %s3267_s3 }
   0x5   :  { %3298 = sst [smem:[#allocation36_spill]] %s3268_s4 }
   0x6   :  { %3299 = sst [smem:[#allocation37_spill]] %s3269_s5 }
   0x7   :  { %3300 = sst [smem:[#allocation38_spill]] %s3270_s6 }
   0x8   :  { %27 = vsyncpa [#allocation3], 0 }
   0x9   :  { %28 = vsyncpa [#allocation6], 0 }
   0xa   :  { %29 = vsyncpa [#allocation9], 0 }
   0xb   :  { %30 = vsyncpa [#allocation12], 0 }
   0xc   :  { %31 = vsyncpa [#allocation15], 0 }
   0xd   :  { %32 = vsyncpa [#allocation18], 0 }
   0xe   :  { %33 = vsyncpa [#allocation21], 0 }
   0xf   :  { %34 = vsyncpa [#allocation4], 0  ;;  %s2757_s3 = smov [#allocation5]   ;;  %s2758_s29 = smov [#allocation8]  }
  0x10   :  { %s57_s28 = sshll.u32 %s2757_s3, 4  ;;  %s79_s30 = sshll.u32 %s2758_s29, 4  ;;  %s58_s28 = int_to_ptr.vmem [resolvable:$true] %s57_s28  ;;  %s80_s30 = int_to_ptr.vmem [resolvable:$true] %s79_s30 }
  0x11   :  { %s3301_s23 = sld [smem:[#allocation35_spill]] }
  0x17   :  { %s2433_s1 = scalar_lea.hbm %s3301_s23, 16 }
  0x18   :  { %p2434_p0 = scmp.ne.s32.totalorder %s3301_s23, %s2433_s1  ;;  %p2437_p1 = scmp.lt.u32.totalorder %s2433_s1, %s3301_s23 }
  0x1a   :  { %p2439_p2 = pnand %p2437_p1, %p2434_p0 }
  0x1c   :  { %2442 = shalt.err (!%p2439_p2)
}
  0x1d   :  { %s2443_s26 = scalar_lea.vmem %s58_s28, 16  ;;  %s2447_s2 = scalar_lea.vmem %s58_s28, 32 }
  0x1e   :  { %p2444_p3 = scmp.ne.s32.totalorder %s58_s28, %s2443_s26  ;;  %p2448_p4 = scmp.lt.s32.totalorder %s58_s28, %s58_s28 }
  0x1f   :  { %p2449_p5 = scmp.lt.s32.totalorder %s2447_s2, %s2443_s26 }
  0x21   :  { %p2450_p6 = por %p2449_p5, %p2448_p4 }
  0x23   :  { %p2451_p7 = pnand %p2450_p6, %p2444_p3 }
  0x25   :  { %2454 = shalt.err (!%p2451_p7)
}
  0x26   :  { %60 = dma.hbm_to_vmem [thread:$0]  %s3301_s23, 16, %s58_s28, [#allocation6]  }
  0x27   :  { %s3302_s0 = sld [smem:[#allocation37_spill]] }
  0x2d   :  { %s2455_s5 = scalar_lea.hbm %s3302_s0, 16 }
  0x2e   :  { %p2456_p8 = scmp.ne.s32.totalorder %s3302_s0, %s2455_s5  ;;  %p2459_p9 = scmp.lt.u32.totalorder %s2455_s5, %s3302_s0 }
  0x30   :  { %p2461_p10 = pnand %p2459_p9, %p2456_p8 }
  0x32   :  { %2464 = shalt.err (!%p2461_p10)
}
  0x33   :  { %s2465_s26 = scalar_lea.vmem %s80_s30, 16  ;;  %s2469_s2 = scalar_lea.vmem %s80_s30, 32 }
  0x34   :  { %p2466_p11 = scmp.ne.s32.totalorder %s80_s30, %s2465_s26  ;;  %p2470_p12 = scmp.lt.s32.totalorder %s80_s30, %s80_s30 }
  0x35   :  { %p2471_p13 = scmp.lt.s32.totalorder %s2469_s2, %s2465_s26 }
  0x37   :  { %p2472_p0 = por %p2471_p13, %p2470_p12 }
  0x39   :  { %p2473_p1 = pnand %p2472_p0, %p2466_p11 }
  0x3b   :  { %2476 = shalt.err (!%p2473_p1)
}
  0x3c   :  { %82 = dma.hbm_to_vmem [thread:$0]  %s3302_s0, 16, %s80_s30, [#allocation9]  }
  0x3d   :  { %s2759_s27 = smov [#allocation11]   ;;  %s2477_s5 = scalar_lea.hbm %s3273_s9, 16 }
  0x3e   :  { %s103_s3 = sshll.u32 %s2759_s27, 4  ;;  %p2478_p2 = scmp.ne.s32.totalorder %s3273_s9, %s2477_s5  ;;  %s104_s3 = int_to_ptr.vmem [resolvable:$true] %s103_s3 }
  0x3f   :  { %p2481_p3 = scmp.lt.u32.totalorder %s2477_s5, %s3273_s9 }
  0x41   :  { %p2483_p4 = pnand %p2481_p3, %p2478_p2 }
  0x43   :  { %2486 = shalt.err (!%p2483_p4)
}
  0x44   :  { %s2487_s26 = scalar_lea.vmem %s104_s3, 16  ;;  %s2491_s30 = scalar_lea.vmem %s104_s3, 32 }
  0x45   :  { %p2488_p5 = scmp.ne.s32.totalorder %s104_s3, %s2487_s26  ;;  %p2492_p6 = scmp.lt.s32.totalorder %s104_s3, %s104_s3 }
  0x46   :  { %p2493_p7 = scmp.lt.s32.totalorder %s2491_s30, %s2487_s26 }
  0x48   :  { %p2494_p8 = por %p2493_p7, %p2492_p6 }
  0x4a   :  { %p2495_p9 = pnand %p2494_p8, %p2488_p5 }
  0x4c   :  { %2498 = shalt.err (!%p2495_p9)
}
  0x4d   :  { %106 = dma.hbm_to_vmem [thread:$0]  %s3273_s9, 16, %s104_s3, [#allocation12]  }
  0x4e   :  { %s2760_s28 = smov [#allocation14]   ;;  %s2761_s27 = smov [#allocation17]  }
  0x4f   :  { %s124_s23 = sshll.u32 %s2760_s28, 4  ;;  %s146_s29 = sshll.u32 %s2761_s27, 4  ;;  %s125_s23 = int_to_ptr.vmem [resolvable:$true] %s124_s23  ;;  %s147_s29 = int_to_ptr.vmem [resolvable:$true] %s146_s29 }
  0x50   :  { %s2499_s24 = scalar_lea.hbm %s3276_s12, 512 }
  0x51   :  { %p2500_p10 = scmp.ne.s32.totalorder %s3276_s12, %s2499_s24  ;;  %p2503_p11 = scmp.lt.u32.totalorder %s2499_s24, %s3276_s12 }
  0x53   :  { %p2505_p12 = pnand %p2503_p11, %p2500_p10 }
  0x55   :  { %2508 = shalt.err (!%p2505_p12)
}
  0x56   :  { %s2509_s9 = scalar_lea.vmem %s125_s23, 512  ;;  %p2514_p0 = scmp.lt.s32.totalorder %s125_s23, %s125_s23 }
  0x57   :  { %p2510_p13 = scmp.ne.s32.totalorder %s125_s23, %s2509_s9  ;;  %p2515_p1 = scmp.lt.s32.totalorder %s2509_s9, %s2509_s9 }
  0x59   :  { %p2516_p2 = por %p2515_p1, %p2514_p0 }
  0x5b   :  { %p2517_p3 = pnand %p2516_p2, %p2510_p13 }
  0x5d   :  { %2520 = shalt.err (!%p2517_p3)
}
  0x5e   :  { %s2762_s3 = smov 128   ;;  %s2763_s30 = smov 8  }
  0x5f   :  { %130 = dma.hbm_to_vmem [thread:$0]  %s3276_s12, 512, %s125_s23, [#allocation15], %s2762_s3, %s2762_s3, %s2763_s30  }
  0x60   :  { %s2521_s4 = scalar_lea.hbm %s3278_s14, 512 }
  0x61   :  { %p2522_p4 = scmp.ne.s32.totalorder %s3278_s14, %s2521_s4  ;;  %p2525_p5 = scmp.lt.u32.totalorder %s2521_s4, %s3278_s14 }
  0x63   :  { %p2527_p6 = pnand %p2525_p5, %p2522_p4 }
  0x65   :  { %2530 = shalt.err (!%p2527_p6)
}
  0x66   :  { %s2531_s25 = scalar_lea.vmem %s147_s29, 512  ;;  %p2536_p8 = scmp.lt.s32.totalorder %s147_s29, %s147_s29 }
  0x67   :  { %p2532_p7 = scmp.ne.s32.totalorder %s147_s29, %s2531_s25  ;;  %p2537_p9 = scmp.lt.s32.totalorder %s2531_s25, %s2531_s25 }
  0x69   :  { %p2538_p10 = por %p2537_p9, %p2536_p8 }
  0x6b   :  { %p2539_p11 = pnand %p2538_p10, %p2532_p7 }
  0x6d   :  { %2542 = shalt.err (!%p2539_p11)
}
  0x6e   :  { %152 = dma.hbm_to_vmem [thread:$0]  %s3278_s14, 512, %s147_s29, [#allocation18], %s2762_s3, %s2762_s3, %s2763_s30  }
  0x6f   :  { %s2764_s26 = smov [#allocation20]   ;;  %s2765_s0 = smov [#allocation2]  }
  0x70   :  { %s171_s9 = sshll.u32 %s2764_s26, 4  ;;  %s42_s2 = sshll.u32 %s2765_s0, 4  ;;  %s172_s9 = int_to_ptr.vmem [resolvable:$true] %s171_s9  ;;  %s43_s2 = int_to_ptr.vmem [resolvable:$true] %s42_s2 }
  0x71   :  { %s2543_s4 = scalar_lea.hbm %s3281_s17, 16 }
  0x72   :  { %p2544_p12 = scmp.ne.s32.totalorder %s3281_s17, %s2543_s4  ;;  %p2547_p13 = scmp.lt.u32.totalorder %s2543_s4, %s3281_s17 }
  0x74   :  { %p2549_p0 = pnand %p2547_p13, %p2544_p12 }
  0x76   :  { %2552 = shalt.err (!%p2549_p0)
}
  0x77   :  { %s2553_s14 = scalar_lea.vmem %s172_s9, 16  ;;  %s2557_s29 = scalar_lea.vmem %s172_s9, 32 }
  0x78   :  { %p2554_p1 = scmp.ne.s32.totalorder %s172_s9, %s2553_s14  ;;  %p2558_p2 = scmp.lt.s32.totalorder %s172_s9, %s172_s9 }
  0x79   :  { %p2559_p3 = scmp.lt.s32.totalorder %s2557_s29, %s2553_s14 }
  0x7b   :  { %p2560_p4 = por %p2559_p3, %p2558_p2 }
  0x7d   :  { %p2561_p5 = pnand %p2560_p4, %p2554_p1 }
  0x7f   :  { %2564 = shalt.err (!%p2561_p5)
}
  0x80   :  { %174 = dma.hbm_to_vmem [thread:$0]  %s3281_s17, 16, %s172_s9, [#allocation21]  }
  0x81   :  { %s3303_s0 = sld [smem:[#allocation33_spill]] }
  0x87   :  { %s2565_s28 = scalar_lea.hbm %s3303_s0, 256 }
  0x88   :  { %p2566_p6 = scmp.ne.s32.totalorder %s3303_s0, %s2565_s28  ;;  %p2569_p7 = scmp.lt.u32.totalorder %s2565_s28, %s3303_s0 }
  0x8a   :  { %p2571_p8 = pnand %p2569_p7, %p2566_p6 }
  0x8c   :  { %2574 = shalt.err (!%p2571_p8)
}
  0x8d   :  { %s2575_s1 = scalar_lea.vmem %s43_s2, 256  ;;  %p2580_p10 = scmp.lt.s32.totalorder %s43_s2, %s43_s2 }
  0x8e   :  { %p2576_p9 = scmp.ne.s32.totalorder %s43_s2, %s2575_s1  ;;  %p2581_p11 = scmp.lt.s32.totalorder %s2575_s1, %s2575_s1 }
  0x90   :  { %p2582_p12 = por %p2581_p11, %p2580_p10 }
  0x92   :  { %p2583_p13 = pnand %p2582_p12, %p2576_p9 }
  0x94   :  { %2586 = shalt.err (!%p2583_p13)
}
  0x95   :  { %48 = dma.hbm_to_vmem [thread:$0]  %s3303_s0, 256, %s43_s2, [#allocation3], %s2762_s3, %s2762_s3, %s2763_s30  }
  0x96   :  { %s2766_s6 = smov [#allocation7]   ;;  %s2767_s29 = smov [#allocation10]  }
  0x97   :  { %s66_s14 = sshll.u32 %s2766_s6, 4  ;;  %s91_s25 = sshll.u32 %s2767_s29, 4  ;;  %s67_s14 = int_to_ptr.vmem [resolvable:$true] %s66_s14  ;;  %s92_s25 = int_to_ptr.vmem [resolvable:$true] %s91_s25 }
  0x98   :  { %s3304_s26 = sld [smem:[#allocation36_spill]] }
  0x9e   :  { %s2587_s28 = scalar_lea.hbm %s3304_s26, 256 }
  0x9f   :  { %p2588_p0 = scmp.ne.s32.totalorder %s3304_s26, %s2587_s28  ;;  %p2591_p1 = scmp.lt.u32.totalorder %s2587_s28, %s3304_s26 }
  0xa1   :  { %p2593_p2 = pnand %p2591_p1, %p2588_p0 }
  0xa3   :  { %2596 = shalt.err (!%p2593_p2)
}
  0xa4   :  { %s2597_s2 = scalar_lea.vmem %s67_s14, 256  ;;  %p2602_p4 = scmp.lt.s32.totalorder %s67_s14, %s67_s14 }
  0xa5   :  { %p2598_p3 = scmp.ne.s32.totalorder %s67_s14, %s2597_s2  ;;  %p2603_p5 = scmp.lt.s32.totalorder %s2597_s2, %s2597_s2 }
  0xa7   :  { %p2604_p6 = por %p2603_p5, %p2602_p4 }
  0xa9   :  { %p2605_p7 = pnand %p2604_p6, %p2598_p3 }
  0xab   :  { %2608 = shalt.err (!%p2605_p7)
}
  0xac   :  { %72 = dma.hbm_to_vmem [thread:$0]  %s3304_s26, 256, %s67_s14, [#allocation6], %s2762_s3, %s2762_s3, %s2763_s30  }
  0xad   :  { %s2609_s6 = scalar_lea.hbm %s3271_s7, 16 }
  0xae   :  { %p2610_p8 = scmp.ne.s32.totalorder %s3271_s7, %s2609_s6  ;;  %p2613_p9 = scmp.lt.u32.totalorder %s2609_s6, %s3271_s7 }
  0xb0   :  { %p2615_p10 = pnand %p2613_p9, %p2610_p8 }
  0xb2   :  { %2618 = shalt.err (!%p2615_p10)
}
  0xb3   :  { %s2619_s27 = scalar_lea.vmem %s92_s25, 16  ;;  %s2623_s4 = scalar_lea.vmem %s92_s25, 32 }
  0xb4   :  { %p2620_p11 = scmp.ne.s32.totalorder %s92_s25, %s2619_s27  ;;  %p2624_p12 = scmp.lt.s32.totalorder %s92_s25, %s92_s25 }
  0xb5   :  { %p2625_p13 = scmp.lt.s32.totalorder %s2623_s4, %s2619_s27 }
  0xb7   :  { %p2626_p0 = por %p2625_p13, %p2624_p12 }
  0xb9   :  { %p2627_p1 = pnand %p2626_p0, %p2620_p11 }
  0xbb   :  { %2630 = shalt.err (!%p2627_p1)
}
  0xbc   :  { %94 = dma.hbm_to_vmem [thread:$0]  %s3271_s7, 16, %s92_s25, [#allocation9]  }
  0xbd   :  { %s2768_s5 = smov [#allocation13]   ;;  %s2769_s2 = smov [#allocation16]  }
  0xbe   :  { %s115_s24 = sshll.u32 %s2768_s5, 4  ;;  %s137_s0 = sshll.u32 %s2769_s2, 4  ;;  %s116_s24 = int_to_ptr.vmem [resolvable:$true] %s115_s24  ;;  %s138_s0 = int_to_ptr.vmem [resolvable:$true] %s137_s0 }
  0xbf   :  { %s2631_s9 = scalar_lea.hbm %s3275_s11, 16 }
  0xc0   :  { %p2632_p2 = scmp.ne.s32.totalorder %s3275_s11, %s2631_s9  ;;  %p2635_p3 = scmp.lt.u32.totalorder %s2631_s9, %s3275_s11 }
  0xc2   :  { %p2637_p4 = pnand %p2635_p3, %p2632_p2 }
  0xc4   :  { %2640 = shalt.err (!%p2637_p4)
}
  0xc5   :  { %s2641_s7 = scalar_lea.vmem %s116_s24, 16  ;;  %s2645_s25 = scalar_lea.vmem %s116_s24, 32 }
  0xc6   :  { %p2642_p5 = scmp.ne.s32.totalorder %s116_s24, %s2641_s7  ;;  %p2646_p6 = scmp.lt.s32.totalorder %s116_s24, %s116_s24 }
  0xc7   :  { %p2647_p7 = scmp.lt.s32.totalorder %s2645_s25, %s2641_s7 }
  0xc9   :  { %p2648_p8 = por %p2647_p7, %p2646_p6 }
  0xcb   :  { %p2649_p9 = pnand %p2648_p8, %p2642_p5 }
  0xcd   :  { %2652 = shalt.err (!%p2649_p9)
}
  0xce   :  { %118 = dma.hbm_to_vmem [thread:$0]  %s3275_s11, 16, %s116_s24, [#allocation12]  }
  0xcf   :  { %s2653_s26 = scalar_lea.hbm %s3277_s13, 16 }
  0xd0   :  { %p2654_p10 = scmp.ne.s32.totalorder %s3277_s13, %s2653_s26  ;;  %p2657_p11 = scmp.lt.u32.totalorder %s2653_s26, %s3277_s13 }
  0xd2   :  { %p2659_p12 = pnand %p2657_p11, %p2654_p10 }
  0xd4   :  { %2662 = shalt.err (!%p2659_p12)
}
  0xd5   :  { %s2663_s9 = scalar_lea.vmem %s138_s0, 16  ;;  %s2667_s6 = scalar_lea.vmem %s138_s0, 32 }
  0xd6   :  { %p2664_p13 = scmp.ne.s32.totalorder %s138_s0, %s2663_s9  ;;  %p2668_p0 = scmp.lt.s32.totalorder %s138_s0, %s138_s0 }
  0xd7   :  { %p2669_p1 = scmp.lt.s32.totalorder %s2667_s6, %s2663_s9 }
  0xd9   :  { %p2670_p2 = por %p2669_p1, %p2668_p0 }
  0xdb   :  { %p2671_p3 = pnand %p2670_p2, %p2664_p13 }
  0xdd   :  { %2674 = shalt.err (!%p2671_p3)
}
  0xde   :  { %140 = dma.hbm_to_vmem [thread:$0]  %s3277_s13, 16, %s138_s0, [#allocation15]  }
  0xdf   :  { %s2770_s29 = smov [#allocation19]   ;;  %s2771_s23 = smov [#allocation22]  }
  0xe0   :  { %s159_s12 = sshll.u32 %s2770_s29, 4  ;;  %s180_s7 = sshll.u32 %s2771_s23, 4  ;;  %s160_s12 = int_to_ptr.vmem [resolvable:$true] %s159_s12  ;;  %s181_s7 = int_to_ptr.vmem [resolvable:$true] %s180_s7 }
  0xe1   :  { %s2675_s27 = scalar_lea.hbm %s3279_s15, 16 }
  0xe2   :  { %p2676_p4 = scmp.ne.s32.totalorder %s3279_s15, %s2675_s27  ;;  %p2679_p5 = scmp.lt.u32.totalorder %s2675_s27, %s3279_s15 }
  0xe4   :  { %p2681_p6 = pnand %p2679_p5, %p2676_p4 }
  0xe6   :  { %2684 = shalt.err (!%p2681_p6)
}
  0xe7   :  { %s2685_s13 = scalar_lea.vmem %s160_s12, 16  ;;  %s2689_s0 = scalar_lea.vmem %s160_s12, 32 }
  0xe8   :  { %p2686_p7 = scmp.ne.s32.totalorder %s160_s12, %s2685_s13  ;;  %p2690_p8 = scmp.lt.s32.totalorder %s160_s12, %s160_s12 }
  0xe9   :  { %p2691_p9 = scmp.lt.s32.totalorder %s2689_s0, %s2685_s13 }
  0xeb   :  { %p2692_p10 = por %p2691_p9, %p2690_p8 }
  0xed   :  { %p2693_p11 = pnand %p2692_p10, %p2686_p7 }
  0xef   :  { %2696 = shalt.err (!%p2693_p11)
}
  0xf0   :  { %162 = dma.hbm_to_vmem [thread:$0]  %s3279_s15, 16, %s160_s12, [#allocation18]  }
  0xf1   :  { %s2697_s6 = scalar_lea.hbm %s3282_s18, 512 }
  0xf2   :  { %p2698_p12 = scmp.ne.s32.totalorder %s3282_s18, %s2697_s6  ;;  %p2701_p13 = scmp.lt.u32.totalorder %s2697_s6, %s3282_s18 }
  0xf4   :  { %p2703_p0 = pnand %p2701_p13, %p2698_p12 }
  0xf6   :  { %2706 = shalt.err (!%p2703_p0)
}
  0xf7   :  { %s2707_s25 = scalar_lea.vmem %s181_s7, 512  ;;  %p2712_p2 = scmp.lt.s32.totalorder %s181_s7, %s181_s7 }
  0xf8   :  { %p2708_p1 = scmp.ne.s32.totalorder %s181_s7, %s2707_s25  ;;  %p2713_p3 = scmp.lt.s32.totalorder %s2707_s25, %s2707_s25 }
  0xfa   :  { %p2714_p4 = por %p2713_p3, %p2712_p2 }
  0xfc   :  { %p2715_p5 = pnand %p2714_p4, %p2708_p1 }
  0xfe   :  { %2718 = shalt.err (!%p2715_p5)
}
  0xff   :  { %186 = dma.hbm_to_vmem [thread:$0]  %s3282_s18, 512, %s181_s7, [#allocation21], %s2762_s3, %s2762_s3, %s2763_s30  }
 0x100   :  { %2741 = dma.done.wait [#allocation3], 256  }
 0x101   :  { %2742 = vsyncadd [#allocation3], 4294967040 }
 0x102   :  { %2743 = dma.done.wait [#allocation6], 272  }
 0x103   :  { %2744 = vsyncadd [#allocation6], 4294967024 }
 0x104   :  { %2745 = dma.done.wait [#allocation9], 32  }
 0x105   :  { %2746 = vsyncadd [#allocation9], 4294967264 }
 0x106   :  { %2747 = dma.done.wait [#allocation12], 32  }
 0x107   :  { %2748 = vsyncadd [#allocation12], 4294967264 }
 0x108   :  { %2749 = dma.done.wait [#allocation15], 528  }
 0x109   :  { %2750 = vsyncadd [#allocation15], 4294966768 }
 0x10a   :  { %2751 = dma.done.wait [#allocation18], 528  }
 0x10b   :  { %2752 = vsyncadd [#allocation18], 4294966768 }
 0x10c   :  { %2753 = dma.done.wait [#allocation21], 528  }
 0x10d   :  { %2754 = vsyncadd [#allocation21], 4294966768  ;;  %s3305_s4 = sld [smem:[#allocation34_spill]]  ;;  %vm251_vm0 = vcmask 523264   ;;  %s3306_s9 = sld [smem:[#allocation32_spill]]  ;;  %vm360_vm1 = vcmask 130048  }
 0x10e   :  { %v351_v9 = vld [vmem:[#allocation7] sm:$0xff]  ;;  %v352_v10 = vld [vmem:[#allocation7 + $0x8] sm:$0xff]  ;;  %s3307_s24 = sld [smem:[#allocation38_spill]]  ;;  %v350_v19 = vld [vmem:[#allocation2 + $0x8] sm:$0xff]  ;;  %vm453_vm2 = vcmask 261120   ;;  %vm2773_vm3 = vmmov 0  }
 0x10f   :  { %v349_v11 = vld [vmem:[#allocation2] sm:$0xff]  ;;  %v2294_v13 = vpack.c.bf16 %v352_v10, %v351_v9  ;;  %v588_v28 = vld [vmem:[%s3272_s8 + $0x8] sm:$0xff]  ;;  %v1971_v32 = vld [vmem:[#allocation5] ss:$0 sm:$0xff]  ;;  %vm1577_vm5 = vcmask 64512   ;;  %vm1874_vm6 = vcmask 1041409  }
 0x110   :  { %2133 = vmatprep.mubr.msk.f32.mxu1 %vm360_vm1, %v349_v11  ;;  %v587_v27 = vld [vmem:[%s3272_s8] sm:$0xff]  ;;  %v589_v34 = vld [vmem:[%s3272_s8 + $0x10] sm:$0xff]  ;;  %v590_v35 = vld [vmem:[%s3272_s8 + $0x18] sm:$0xff]  ;;  %s2777_s29 = smov [#allocation23]   ;;  %vm1948_vm7 = vcmask 25600  }
 0x111   :  { %2295 = vmatprep.subr.bf16.mxu1 %v2294_v13  ;;  %v2306_v29 = vpack.c.bf16 %v588_v28, %v587_v27  ;;  %v1976_v39 = vld [vmem:[#allocation8] ss:$0 sm:$0xff]  ;;  %v2310_v40 = vpack.c.bf16 %v590_v35, %v589_v34  ;;  %v789_v47 = vld [vmem:[#allocation14] sm:$0xff]  ;;  %v790_v48 = vld [vmem:[#allocation14 + $0x8] sm:$0xff]  ;;  %s1956_s23 = sshll.u32 %s2777_s29, 4  ;;  %s1957_s23 = int_to_ptr.vmem [resolvable:$true] %s1956_s23 }
 0x112   :  { %2297 = vmatpush3.bf16.msra.mxu1 %v2294_v13  ;;  %v2322_v49 = vpack.c.bf16 %v790_v48, %v789_v47  ;;  %v791_v50 = vld [vmem:[#allocation14 + $0x10] sm:$0xff]  ;;  %v792_v51 = vld [vmem:[#allocation14 + $0x18] sm:$0xff]  ;;  %v699_v56 = vld [vmem:[%s3274_s10 + $0x10] sm:$0xff]  ;;  %s2719_s25 = scalar_lea.vmem %s1957_s23, 32  ;;  %p2724_p7 = scmp.lt.s32.totalorder %s1957_s23, %s1957_s23 }
 0x113   :  { %v236_v0 = vld [vmem:[%s3305_s4] sm:$0xff]  ;;  %v237_v1 = vld [vmem:[%s3305_s4 + $0x8] sm:$0xff]  ;;  %v238_v2 = vld [vmem:[%s3305_s4 + $0x10] sm:$0xff]  ;;  %v2326_v52 = vpack.c.bf16 %v792_v51, %v791_v50  ;;  %p2720_p6 = scmp.ne.s32.totalorder %s1957_s23, %s2719_s25  ;;  %p2725_p8 = scmp.lt.s32.totalorder %s2719_s25, %s2719_s25 }
 0x114   :  { %v2278_v3 = vpack.c.bf16 %v237_v1, %v236_v0  ;;  %v239_v4 = vld [vmem:[%s3305_s4 + $0x18] sm:$0xff]  ;;  %v240_v6 = vld [vmem:[%s3305_s4 + $0x20] sm:$0xff]  ;;  %v241_v7 = vld [vmem:[%s3305_s4 + $0x28] sm:$0xff] }
 0x115   :  { %v2282_v5 = vpack.c.bf16 %v239_v4, %v238_v2  ;;  %v232_v8 = vld [vmem:[%s3306_s9] sm:$0xff]  ;;  %v2286_v12 = vpack.c.bf16 %v241_v7, %v240_v6  ;;  %v443_v15 = vld [vmem:[%s3307_s24 + $0x8] sm:$0xff]  ;;  %v242_v16 = vld [vmem:[%s3305_s4 + $0x30] sm:$0xff]  ;;  %2134 = vmatmul.mubr.msk.f32.vlgmr.msra.gmra.mrb[0].mxu1 %vm360_vm1, %v350_v19  ;;  %p2726_p9 = por %p2725_p8, %p2724_p7 }
 0x116   :  { %2279 = vmatprep.subr.bf16.mxu0 %v2278_v3  ;;  %2123 = vmatprep.mubr.msk.f32.mxu0 %vm251_vm0, %v232_v8  ;;  %v442_v14 = vld [vmem:[%s3307_s24] sm:$0xff]  ;;  %v243_v17 = vld [vmem:[%s3305_s4 + $0x38] sm:$0xff]  ;;  %v233_v21 = vld [vmem:[%s3306_s9 + $0x8] sm:$0xff] }
 0x117   :  { %2281 = vmatpush3.bf16.msra.mxu0 %v2278_v3  ;;  %v2298_v18 = vpack.c.bf16 %v443_v15, %v442_v14  ;;  %v2290_v20 = vpack.c.bf16 %v243_v17, %v242_v16  ;;  %v234_v22 = vld [vmem:[%s3306_s9 + $0x10] sm:$0xff]  ;;  %v235_v23 = vld [vmem:[%s3306_s9 + $0x18] sm:$0xff]  ;;  %v697_v53 = vld [vmem:[%s3274_s10] sm:$0xff]  ;;  %p2727_p10 = pnand %p2726_p9, %p2720_p6 }
 0x118   :  { %2283 = vmatprep.subr.bf16.mxu0 %v2282_v5  ;;  %v444_v24 = vld [vmem:[%s3307_s24 + $0x10] sm:$0xff]  ;;  %v445_v25 = vld [vmem:[%s3307_s24 + $0x18] sm:$0xff]  ;;  %v698_v54 = vld [vmem:[%s3274_s10 + $0x8] sm:$0xff] }
 0x119   :  { %2299 = vmatprep.subr.bf16.mxu1 %v2298_v18  ;;  %v2302_v26 = vpack.c.bf16 %v445_v25, %v444_v24  ;;  %v2314_v55 = vpack.c.bf16 %v698_v54, %v697_v53  ;;  %v700_v57 = vld [vmem:[%s3274_s10 + $0x18] sm:$0xff]  ;;  %v1979_v59 = vld [vmem:[#allocation10] ss:$0 sm:$0xff]  ;;  %v1984_v8 = vld [vmem:[#allocation11] ss:$0 sm:$0xff]  ;;  %s2775_s10 = smov 96  }
 0x11a   :  { %2301 = vmatpush3.bf16.msra.mxu1 %v2298_v18  ;;  %v2318_v58 = vpack.c.bf16 %v700_v57, %v699_v56  ;;  %vm2332_vm4 = vmpackc.low %vm453_vm2, %vm453_vm2 }
 0x11b   :  { %2285 = vmatpush3.bf16.msra.mxu0 %v2282_v5  ;;  %2303 = vmatprep.subr.bf16.mxu1 %v2302_v26 }
 0x11c   :  { %2287 = vmatprep.subr.bf16.mxu0 %v2286_v12 }
 0x11e   :  { %2305 = vmatpush3.bf16.msra.mxu1 %v2302_v26 }
 0x11f   :  { %2289 = vmatpush3.bf16.msra.mxu0 %v2286_v12  ;;  %2307 = vmatprep.subr.bf16.mxu1 %v2306_v29 }
 0x120   :  { %2291 = vmatprep.subr.bf16.mxu0 %v2290_v20 }
 0x123   :  { %2293 = vmatpush3.bf16.msra.mxu0 %v2290_v20 }
 0x124   :  { %2315 = vmatprep.subr.bf16.mxu0 %v2314_v55 }
 0x126   :  { %2124 = vmatmul.mubr.msk.f32.vlgmr.msra.gmra.mrb[0].mxu0 %vm251_vm0, %v233_v21 }
 0x127   :  { %2126 = vmatprep.mubr.msk.f32.mxu0 %vm251_vm0, %v234_v22  ;;  %2317 = vmatpush3.bf16.msra.mxu0 %v2314_v55 }
 0x128   :  { %2319 = vmatprep.subr.bf16.mxu0 %v2318_v58 }
 0x12a   :  { %2127 = vmatmul.mubr.msk.f32.gmra.mrb[2].mxu0 %vm251_vm0, %v235_v23 }
 0x12b   :  { %2321 = vmatpush3.bf16.msra.mxu0 %v2318_v58 }
 0x1e8   :  { %v2135_v30 = vpop.f32.mrb[0].mxu1 }
 0x1e9   :  { %v433_v31 = vpop.f32.mrb[1].mxu1  ;;  %v439_v46 = vadd.f32 %v2135_v30, %v1976_v39 }
 0x1ea   :  { %v434_v44 = vadd.f32 %v1976_v39, %v433_v31 }
 0x1f9   :  { %v2125_v33 = vpop.f32.mrb[0].mxu0 }
 0x1fa   :  { %v330_v36 = vpop.f32.mrb[1].mxu0  ;;  %v336_v38 = vadd.f32 %v2125_v33, %v1971_v32 }
 0x1fb   :  { %v331_v37 = vadd.f32 %v1971_v32, %v330_v36 }
 0x1fd   :  { %v2128_v41 = vpop.f32.mrb[2].mxu0  ;;  %2144 = vmatprep.mubr.msk.f32.mxu1 %vm453_vm2, %v331_v37 }
 0x1fe   :  { %v340_v42 = vpop.f32.mrb[3].mxu0  ;;  %2145 = vmatmul.mubr.msk.f32.vlgmr.msra.gmra.mrb[2].mxu1 %vm453_vm2, %v336_v38  ;;  %v346_v45 = vadd.f32 %v2128_v41, %v1971_v32 }
 0x1ff   :  { %v341_v43 = vadd.f32 %v1971_v32, %v340_v42  ;;  %2309 = vmatpush3.bf16.msra.mxu1 %v2306_v29 }
 0x200   :  { %2311 = vmatprep.subr.bf16.mxu1 %v2310_v40 }
 0x201   :  { %2147 = vmatprep.mubr.msk.f32.mxu1 %vm453_vm2, %v341_v43 }
 0x202   :  { %2148 = vmatmul.mubr.msk.f32.gmra.mrb[4].mxu1 %vm453_vm2, %v346_v45 }
 0x203   :  { %2313 = vmatpush3.bf16.msra.mxu1 %v2310_v40  ;;  %2158 = vmatprep.mubr.msk.f32.mxu1 %vm453_vm2, %v434_v44 }
 0x204   :  { %2323 = vmatprep.subr.bf16.mxu1 %v2322_v49 }
 0x206   :  { %2159 = vmatmul.mubr.msk.f32.vlgmr.msra.gmra.mrb[6].mxu1 %vm453_vm2, %v439_v46 }
 0x207   :  { %2325 = vmatpush3.bf16.msra.mxu1 %v2322_v49 }
 0x208   :  { %2327 = vmatprep.subr.bf16.mxu1 %v2326_v52 }
 0x20b   :  { %2329 = vmatpush3.bf16.msra.mxu1 %v2326_v52 }
 0x2d1   :  { %v2146_v60 = vpop.f32.mrb[2].mxu1 }
 0x2d2   :  { %v538_v61 = vadd.f32 %v2146_v60, %v1979_v59  ;;  %v532_v62 = vpop.f32.mrb[3].mxu1 }
 0x2d3   :  { %v533_v63 = vadd.f32 %v1979_v59, %v532_v62 }
 0x2d4   :  { %v552_v0 = vmul.f32 %v538_v61, %v538_v61 }
 0x2d5   :  { %v551_v1 = vmul.f32 %v533_v63, %v533_v63  ;;  %v2149_v2 = vpop.f32.mrb[4].mxu1 }
 0x2d6   :  { %v556_v3 = vmul.f32 %v552_v0, %v538_v61  ;;  %v3148_v4 = vadd.f32 %v2149_v2, %v1979_v59  ;;  %v542_v5 = vpop.f32.mrb[5].mxu1  ;;  %v2774_v0 = vmov 0.0  }
 0x2d7   :  { %v555_v6 = vmul.f32 %v551_v1, %v533_v63  ;;  %v543_v7 = vadd.f32 %v1979_v59, %v542_v5  ;;  %v1990_v1 = vld [vmem:[#allocation16] ss:$0 sm:$0xff] }
 0x2d8   :  { %v560_v9 = vmul.f32 0.044715, %v556_v3  ;;  %v554_v10 = vmul.f32 %v3148_v4, %v3148_v4 }
 0x2d9   :  { %v559_v11 = vmul.f32 0.044715, %v555_v6  ;;  %v553_v12 = vmul.f32 %v543_v7, %v543_v7  ;;  %v2160_v13 = vpop.f32.mrb[6].mxu1 }
 0x2da   :  { %v564_v14 = vadd.f32 %v560_v9, %v538_v61  ;;  %v558_v15 = vmul.f32 %v554_v10, %v3148_v4  ;;  %v676_v16 = vadd.f32 %v2160_v13, %v1984_v8  ;;  %v670_v17 = vpop.f32.mrb[7].mxu1 }
 0x2db   :  { %v563_v18 = vadd.f32 %v559_v11, %v533_v63  ;;  %v557_v19 = vmul.f32 %v553_v12, %v543_v7  ;;  %v671_v20 = vadd.f32 %v1984_v8, %v670_v17  ;;  %v1987_v12 = vld [vmem:[#allocation13] ss:$0 sm:$0xff] }
 0x2dc   :  { %v568_v21 = vmul.f32 0.7978846, %v564_v14  ;;  %v562_v22 = vmul.f32 0.044715, %v558_v15  ;;  %v680_v23 = vmul.f32 %v676_v16, %v676_v16 }
 0x2dd   :  { %v567_v24 = vmul.f32 0.7978846, %v563_v18  ;;  %v561_v25 = vmul.f32 0.044715, %v557_v19  ;;  %v679_v26 = vmul.f32 %v671_v20, %v671_v20 }
 0x2de   :  { %2405 = vtanh.f32 %v568_v21  ;;  %v566_v27 = vadd.f32 %v562_v22, %v3148_v4  ;;  %v682_v28 = vmul.f32 %v680_v23, %v676_v16 }
 0x2df   :  { %2407 = vtanh.f32 %v567_v24  ;;  %v565_v29 = vadd.f32 %v561_v25, %v543_v7  ;;  %v681_v30 = vmul.f32 %v679_v26, %v671_v20 }
 0x2e0   :  { %v570_v31 = vmul.f32 0.7978846, %v566_v27  ;;  %v684_v32 = vmul.f32 0.044715, %v682_v28 }
 0x2e1   :  { %v569_v33 = vmul.f32 0.7978846, %v565_v29  ;;  %v683_v34 = vmul.f32 0.044715, %v681_v30 }
 0x2e2   :  { %2409 = vtanh.f32 %v570_v31  ;;  %v686_v35 = vadd.f32 %v684_v32, %v676_v16 }
 0x2e3   :  { %2411 = vtanh.f32 %v569_v33  ;;  %v685_v36 = vadd.f32 %v683_v34, %v671_v20 }
 0x2e4   :  { %v688_v37 = vmul.f32 0.7978846, %v686_v35 }
 0x2e5   :  { %v687_v38 = vmul.f32 0.7978846, %v685_v36 }
 0x2e6   :  { %2413 = vtanh.f32 %v688_v37 }
 0x2e7   :  { %2415 = vtanh.f32 %v687_v38 }
 0x2e8   :  { %v2406_v39 = vpop.eup %2405 }
 0x2e9   :  { %v2408_v40 = vpop.eup %2407  ;;  %v576_v41 = vadd.f32 1.0, %v2406_v39 }
 0x2ea   :  { %v575_v42 = vadd.f32 1.0, %v2408_v40 }
 0x2eb   :  { %v580_v43 = vmul.f32 0.5, %v576_v41  ;;  %v1237_v41 = vld [vmem:[#allocation17] sm:$0xff] }
 0x2ec   :  { %v2410_v44 = vpop.eup %2409  ;;  %v579_v45 = vmul.f32 0.5, %v575_v42  ;;  %v1238_v42 = vld [vmem:[#allocation17 + $0x8] sm:$0xff] }
 0x2ed   :  { %v2412_v46 = vpop.eup %2411  ;;  %v578_v47 = vadd.f32 1.0, %v2410_v44  ;;  %v584_v50 = vmul.f32 %v580_v43, %v538_v61  ;;  %v2344_v43 = vpack.c.bf16 %v1238_v42, %v1237_v41 }
 0x2ee   :  { %v583_v48 = vmul.f32 %v579_v45, %v533_v63  ;;  %v577_v49 = vadd.f32 1.0, %v2412_v46  ;;  %v2772_v63 = vmov 0.0|0.0  }
 0x2ef   :  { %v582_v51 = vmul.f32 0.5, %v578_v47  ;;  %2330 = vmatprep.subr.bf16.mxu0 %v2772_v63  ;;  %2334 = vmatprep.subr.bf16.mxu1 %v2772_v63 }
 0x2f0   :  { %v2414_v52 = vpop.eup %2413  ;;  %2180 = vmatprep.mubr.msk.f32.mxu1 %vm453_vm2, %v583_v48  ;;  %v581_v53 = vmul.f32 0.5, %v577_v49 }
 0x2f1   :  { %v2416_v54 = vpop.eup %2415  ;;  %v692_v55 = vadd.f32 1.0, %v2414_v52  ;;  %2181 = vmatmul.mubr.msk.f32.vlgmr.msra.gmra.mrb[8].mxu1 %vm453_vm2, %v584_v50  ;;  %v586_v59 = vmul.f32 %v582_v51, %v3148_v4 }
 0x2f2   :  { %v585_v56 = vmul.f32 %v581_v53, %v543_v7  ;;  %v691_v57 = vadd.f32 1.0, %v2416_v54  ;;  %v1239_v54 = vld [vmem:[#allocation17 + $0x10] sm:$0xff] }
 0x2f3   :  { %v694_v58 = vmul.f32 0.5, %v692_v55  ;;  %v1240_v55 = vld [vmem:[#allocation17 + $0x18] sm:$0xff] }
 0x2f4   :  { %2183 = vmatprep.mubr.msk.f32.mxu1 %vm453_vm2, %v585_v56  ;;  %v693_v60 = vmul.f32 0.5, %v691_v57  ;;  %v2348_v56 = vpack.c.bf16 %v1240_v55, %v1239_v54  ;;  %v1329_v57 = vld [vmem:[%s3280_s16] sm:$0xff]  ;;  %v1863_v55 = vld [vmem:[%s3284_s20 + $0x10] sm:$0xff] }
 0x2f5   :  { %2184 = vmatmul.mubr.msk.f32.gmra.mrb[10].mxu1 %vm453_vm2, %v586_v59  ;;  %v696_v62 = vmul.f32 %v694_v58, %v676_v16  ;;  %v1330_v58 = vld [vmem:[%s3280_s16 + $0x8] sm:$0xff] }
 0x2f6   :  { %v695_v61 = vmul.f32 %v693_v60, %v671_v20  ;;  %2197 = vmatprep.mubr.msk.f32.mxu1 %vm2773_vm3, %v2774_v0  ;;  %v2352_v59 = vpack.c.bf16 %v1330_v58, %v1329_v57  ;;  %v2015_v58 = vld [vmem:[%s3283_s19] ss:$0 sm:$0xff] }
 0x2f8   :  { %2169 = vmatprep.mubr.msk.f32.mxu0 %vm453_vm2, %v695_v61 }
 0x2f9   :  { %2170 = vmatmul.mubr.msk.f32.vlgmr.msra.gmra.mrb[4].mxu0 %vm453_vm2, %v696_v62 }
 0x2fa   :  { %2190 = vmatprep.mubr.msk.f32.mxu0 %vm2773_vm3, %v2774_v0 }
 0x3c4   :  { %v2182_v2 = vpop.f32.mrb[8].mxu1 }
 0x3c5   :  { %v884_v3 = vadd.f32 %v2182_v2, %v1990_v1  ;;  %v878_v4 = vpop.f32.mrb[9].mxu1  ;;  %v1331_v2 = vld [vmem:[%s3280_s16 + $0x10] sm:$0xff] }
 0x3c6   :  { %v879_v5 = vadd.f32 %v1990_v1, %v878_v4 }
 0x3c8   :  { %v2395_v6 = vpack.i.bf16 %v884_v3, %v879_v5  ;;  %v2331_v7 = vpack.c.bf16 %v884_v3, %v879_v5  ;;  %v2185_v8 = vpop.f32.mrb[10].mxu1  ;;  %v1332_v3 = vld [vmem:[%s3280_s16 + $0x18] sm:$0xff]  ;;  %v2003_v5 = vld [vmem:[#allocation19] ss:$0 sm:$0xff]  ;;  %s2776_s16 = smov 64  }
 0x3c9   :  { %v894_v9 = vadd.f32 %v2185_v8, %v1990_v1  ;;  %v888_v10 = vpop.f32.mrb[11].mxu1  ;;  %v2356_v4 = vpack.c.bf16 %v1332_v3, %v1331_v2 }
 0x3ca   :  { %v889_v11 = vadd.f32 %v1990_v1, %v888_v10  ;;  %2333 = vmatpush3.bf16.xpose.msk.msra.mxu0 %vm2332_vm4, %v2331_v7  ;;  %v2006_v10 = vld [vmem:[#allocation20] ss:$0 sm:$0xff] }
 0x3cb   :  { %2338 = vmatprep.subr.bf16.mxu0 %v2772_v63 }
 0x3cc   :  { %v2400_v13 = vpack.i.bf16 %v894_v9, %v889_v11  ;;  %v2335_v14 = vpack.c.bf16 %v894_v9, %v889_v11  ;;  %v2171_v15 = vpop.f32.mrb[4].mxu0 }
 0x3cd   :  { %v780_v16 = vpop.f32.mrb[5].mxu0  ;;  %v786_v18 = vadd.f32 %v2171_v15, %v1987_v12 }
 0x3ce   :  { %v781_v17 = vadd.f32 %v1987_v12, %v780_v16  ;;  %2337 = vmatpush3.bf16.xpose.msk.msra.mxu1 %vm2332_vm4, %v2335_v14 }
 0x3cf   :  { %2345 = vmatprep.subr.bf16.mxu1 %v2344_v43 }
 0x3d1   :  { %2191 = vmatmul.mubr.msk.f32.vlgmr.msra.gmra.mrb[6].mxu0 %vm453_vm2, %v781_v17 }
 0x3d2   :  { %2204 = vmatprep.mubr.msk.f32.mxu0 %vm2773_vm3, %v2774_v0 }
 0x3d5   :  { %2198 = vmatmul.mubr.msk.f32.vlgmr.msra.gmra.mrb[12].mxu1 %vm453_vm2, %v786_v18 }
 0x3d6   :  { %2347 = vmatpush3.bf16.msra.mxu1 %v2344_v43 }
 0x3d7   :  { %2349 = vmatprep.subr.bf16.mxu1 %v2348_v56 }
 0x3da   :  { %2351 = vmatpush3.bf16.msra.mxu1 %v2348_v56  ;;  %v1864_v56 = vld [vmem:[%s3284_s20 + $0x18] sm:$0xff] }
 0x3db   :  { %2236 = vmatprep.subr.mxu1 %v2774_v0  ;;  %v2372_v57 = vpack.c.bf16 %v1864_v56, %v1863_v55 }
 0x4a4   :  { %v972_v19 = vpop.f32.mrb[6].mxu0 }
 0x4a5   :  { %v1055_v20 = vmul.f32 0.17677669, %v972_v19  ;;  %v2192_v21 = vpop.f32.mrb[7].mxu0 }
 0x4a7   :  { %v1057_v22 = vsel %vm360_vm1, %v1055_v20, -inf }
 0x4a8   :  { %v1051_v23 = vpop.f32.mrb[12].mxu1  ;;  %1058 = vmax.xlane.f32.xlu0 %v1057_v22 }
 0x4a9   :  { %v1056_v24 = vmul.f32 0.17677669, %v1051_v23  ;;  %v2199_v25 = vpop.f32.mrb[13].mxu1 }
 0x4ab   :  { %v1060_v26 = vsel %vm360_vm1, %v1056_v24, -inf }
 0x4ac   :  { %1061 = vmax.xlane.f32.xlu0 %v1060_v26 }
 0x4c2   :  { %2396 = vrot.lane.b32.xlu0 %v2395_v6, %s2775_s10 }
 0x535   :  { %v1059_v27 = vpop.xlane.xlu0 %1058 }
 0x536   :  { %v1063_v28 = vsub.f32 %v1055_v20, %v1059_v27 }
 0x538   :  { %v1065_v29 = vmul.f32 1.442695, %v1063_v28 }
 0x539   :  { %v1062_v30 = vpop.xlane.xlu0 %1061 }
 0x53a   :  { %2417 = vpow2.f32 %v1065_v29  ;;  %v1064_v31 = vsub.f32 %v1056_v24, %v1062_v30 }
 0x53c   :  { %v1067_v32 = vmul.f32 1.442695, %v1064_v31 }
 0x53d   :  { %v2397_v33 = vpop.permute.xlu0 %2396 }
 0x53e   :  { %2419 = vpow2.f32 %v1067_v32  ;;  %v2399_v34 = vunpack.i.h.bf16 %v2397_v33  ;;  %v2398_v35 = vunpack.i.l.bf16 %v2397_v33 }
 0x540   :  { %v2339_v36 = vpack.c.bf16 %v2399_v34, %v2398_v35 }
 0x542   :  { %2340 = vmatpush3.bf16.msra.mxu0 %v2339_v36 }
 0x543   :  { %2341 = vmatprep.subr.bf16.mxu0 %v2772_v63 }
 0x544   :  { %v2418_v37 = vpop.eup %2417 }
 0x545   :  { %v1069_v38 = vsel %vm360_vm1, %v2418_v37, 0.0 }
 0x546   :  { %1070 = vadd.xlane.f32.xlu1 %v1069_v38  ;;  %v1753_v38 = vld [vmem:[#allocation22 + $0x8] sm:$0xff] }
 0x548   :  { %v2420_v39 = vpop.eup %2419 }
 0x549   :  { %v1072_v40 = vsel %vm360_vm1, %v2420_v39, 0.0 }
 0x54a   :  { %1073 = vadd.xlane.f32.xlu1 %v1072_v40 }
 0x55b   :  { %2401 = vrot.lane.b32.xlu1 %v2400_v13, %s2775_s10 }
 0x5d3   :  { %v1071_v44 = vpop.xlane.xlu1 %1070 }
 0x5d4   :  { %2421 = vrcp.f32 %v1071_v44 }
 0x5d7   :  { %v1074_v45 = vpop.xlane.xlu1 %1073 }
 0x5d8   :  { %2423 = vrcp.f32 %v1074_v45 }
 0x5db   :  { %v2402_v46 = vpop.permute.xlu1 %2401 }
 0x5dc   :  { %v2404_v47 = vunpack.i.h.bf16 %v2402_v46  ;;  %v2403_v48 = vunpack.i.l.bf16 %v2402_v46  ;;  %v1754_v46 = vld [vmem:[#allocation22 + $0x10] sm:$0xff] }
 0x5de   :  { %v2422_v49 = vpop.eup %2421  ;;  %v2342_v50 = vpack.c.bf16 %v2404_v47, %v2403_v48  ;;  %v1755_v47 = vld [vmem:[#allocation22 + $0x18] sm:$0xff] }
 0x5df   :  { %v1077_v51 = vmul.f32 %v2422_v49, %v2418_v37  ;;  %v1752_v37 = vld [vmem:[#allocation22] sm:$0xff]  ;;  %v2364_v48 = vpack.c.bf16 %v1755_v47, %v1754_v46 }
 0x5e0   :  { %v2360_v40 = vpack.c.bf16 %v1753_v38, %v1752_v37 }
 0x5e1   :  { %2205 = vmatmul.mubr.msk.f32.vlgmr.msra.gmra.mrb[8].mxu0 %vm360_vm1, %v1077_v51 }
 0x5e2   :  { %v2424_v52 = vpop.eup %2423  ;;  %2343 = vmatpush3.bf16.msra.mxu0 %v2342_v50  ;;  %2211 = vmatprep.mubr.msk.f32.mxu0 %vm2773_vm3, %v2774_v0 }
 0x5e3   :  { %v1078_v53 = vmul.f32 %v2424_v52, %v2420_v39  ;;  %2353 = vmatprep.subr.bf16.mxu0 %v2352_v59 }
 0x5e5   :  { %2212 = vmatmul.mubr.msk.f32.vlgmr.msra.gmra.mrb[10].mxu0 %vm360_vm1, %v1078_v53  ;;  %v1862_v53 = vld [vmem:[%s3284_s20 + $0x8] sm:$0xff] }
 0x5e6   :  { %2355 = vmatpush3.bf16.msra.mxu0 %v2352_v59 }
 0x5e7   :  { %2357 = vmatprep.subr.bf16.mxu0 %v2356_v4 }
 0x5ea   :  { %2359 = vmatpush3.bf16.msra.mxu0 %v2356_v4 }
 0x5eb   :  { %2241 = vmatprep.subr.mxu0 %v2774_v0 }
 0x6b4   :  { %v1154_v60 = vpop.f32.mrb[8].mxu0 }
 0x6b5   :  { %v2206_v61 = vpop.f32.mrb[9].mxu0  ;;  %2222 = vmatprep.mubr.msk.f32.mxu1 %vm453_vm2, %v1154_v60 }
 0x6b8   :  { %v1233_v62 = vpop.f32.mrb[10].mxu0 }
 0x6b9   :  { %v2213_v1 = vpop.f32.mrb[11].mxu0  ;;  %2223 = vmatmul.mubr.msk.f32.vlgmr.msra.gmra.mrb[14].mxu1 %vm453_vm2, %v1233_v62 }
 0x6ba   :  { %2238 = vmatprep.mubr.msk.f32.mxu1 %vm2773_vm3, %v2774_v0 }
 0x78c   :  { %v2224_v6 = vpop.f32.mrb[14].mxu1 }
 0x78d   :  { %v1320_v7 = vpop.f32.mrb[15].mxu1  ;;  %v1326_v9 = vadd.f32 %v2224_v6, %v2003_v5 }
 0x78e   :  { %v1321_v8 = vadd.f32 %v2003_v5, %v1320_v7 }
 0x790   :  { %2233 = vmatprep.mubr.msk.f32.mxu0 %vm453_vm2, %v1321_v8 }
 0x791   :  { %2234 = vmatmul.mubr.msk.f32.vlgmr.msra.gmra.mrb[12].mxu0 %vm453_vm2, %v1326_v9 }
 0x792   :  { %2243 = vmatprep.mubr.msk.f32.mxu0 %vm2773_vm3, %v2774_v0 }
 0x864   :  { %v2235_v11 = vpop.f32.mrb[12].mxu0 }
 0x865   :  { %v1412_v12 = vpop.f32.mrb[13].mxu0  ;;  %v1418_v14 = vadd.f32 %v2235_v11, %v2006_v10 }
 0x866   :  { %v1413_v13 = vadd.f32 %v2006_v10, %v1412_v12 }
 0x868   :  { %1422 = vrot.lane.b32.xlu1 %v1413_v13, %s2775_s10 }
 0x86c   :  { %1499 = vrot.lane.b32.xlu1 %v1418_v14, %s2775_s10 }
 0x8da   :  { %v1423_v15 = vpop.permute.xlu1 %1422 }
 0x8db   :  { %2237 = vmatpush3.xpose.msk.msra.mxu1 %vm453_vm2, %v1423_v15 }
 0x8dc   :  { %2246 = vmatprep.subr.mxu1 %v2774_v0 }
 0x8de   :  { %2239 = vmatmul.mubr.msk.f32.vlgmr.msra.gmra.mrb[16].mxu1 %vm453_vm2, %v1413_v13  ;;  %v1500_v16 = vpop.permute.xlu1 %1499 }
 0x8df   :  { %2242 = vmatpush3.xpose.msk.msra.mxu0 %vm453_vm2, %v1500_v16  ;;  %2248 = vmatprep.mubr.msk.f32.mxu1 %vm2773_vm3, %v2774_v0 }
 0x8e0   :  { %2251 = vmatprep.subr.mxu0 %v2774_v0 }
 0x8e2   :  { %2244 = vmatmul.mubr.msk.f32.vlgmr.msra.gmra.mrb[14].mxu0 %vm453_vm2, %v1418_v14 }
 0x8e3   :  { %2253 = vmatprep.mubr.msk.f32.mxu0 %vm2773_vm3, %v2774_v0 }
 0x9b1   :  { %v1494_v17 = vpop.f32.mrb[16].mxu1 }
 0x9b2   :  { %v1575_v18 = vmul.f32 0.17677669, %v1494_v17  ;;  %v2240_v19 = vpop.f32.mrb[17].mxu1  ;;  %v2018_v17 = vld [vmem:[%s3285_s21] ss:$0 sm:$0xff] }
 0x9b4   :  { %v1578_v20 = vsel %vm1577_vm5, %v1575_v18, -inf }
 0x9b5   :  { %1579 = vmax.xlane.f32.xlu0 %v1578_v20  ;;  %v1571_v21 = vpop.f32.mrb[14].mxu0 }
 0x9b6   :  { %v1576_v22 = vmul.f32 0.17677669, %v1571_v21  ;;  %v2245_v23 = vpop.f32.mrb[15].mxu0 }
 0x9b8   :  { %v1581_v24 = vsel %vm1577_vm5, %v1576_v22, -inf }
 0x9b9   :  { %1582 = vmax.xlane.f32.xlu1 %v1581_v24 }
 0x9ca   :  { %1676 = vrot.lane.b32.xlu1 %v1418_v14, %s2776_s16 }
 0xa42   :  { %v1580_v25 = vpop.xlane.xlu0 %1579 }
 0xa43   :  { %v1584_v26 = vsub.f32 %v1575_v18, %v1580_v25 }
 0xa45   :  { %v1586_v29 = vmul.f32 1.442695, %v1584_v26 }
 0xa46   :  { %v1583_v27 = vpop.xlane.xlu1 %1582 }
 0xa47   :  { %v1585_v28 = vsub.f32 %v1576_v22, %v1583_v27 }
 0xa49   :  { %v1588_v30 = vmul.f32 1.442695, %v1585_v28 }
 0xa4a   :  { %v1677_v31 = vpop.permute.xlu1 %1676 }
 0xa4b   :  { %2425 = vpow2.f32 %v1588_v30  ;;  %2252 = vmatpush3.msra.mxu0 %v1677_v31 }
 0xa4c   :  { %2368 = vmatprep.subr.bf16.mxu0 %v2772_v63  ;;  %2427 = vpow2.f32 %v1586_v29 }
 0xa55   :  { %v2426_v32 = vpop.eup %2425 }
 0xa56   :  { %v1593_v33 = vsel %vm1577_vm5, %v2426_v32, 0.0  ;;  %v2428_v34 = vpop.eup %2427 }
 0xa57   :  { %1594 = vadd.xlane.f32.xlu0 %v1593_v33  ;;  %v1590_v35 = vsel %vm1577_vm5, %v2428_v34, 0.0 }
 0xa5b   :  { %1591 = vadd.xlane.f32.xlu0 %v1590_v35 }
 0xa71   :  { %1600 = vrot.lane.b32.xlu0 %v1413_v13, %s2776_s16 }
 0xae4   :  { %v1595_v36 = vpop.xlane.xlu0 %1594 }
 0xae5   :  { %2429 = vrcp.f32 %v1595_v36 }
 0xae8   :  { %v1592_v39 = vpop.xlane.xlu0 %1591 }
 0xae9   :  { %2431 = vrcp.f32 %v1592_v39 }
 0xaec   :  { %v1601_v41 = vpop.permute.xlu0 %1600 }
 0xaed   :  { %2247 = vmatpush3.msra.mxu1 %v1601_v41 }
 0xaee   :  { %2361 = vmatprep.subr.bf16.mxu1 %v2360_v40 }
 0xaef   :  { %v2430_v42 = vpop.eup %2429 }
 0xaf0   :  { %v1599_v43 = vmul.f32 %v2430_v42, %v2426_v32 }
 0xaf2   :  { %2254 = vmatmul.mubr.msk.f32.vlgmr.msra.gmra.mrb[16].mxu0 %vm1577_vm5, %v1599_v43 }
 0xaf3   :  { %v2432_v44 = vpop.eup %2431  ;;  %2275 = vmatprep.mubr.msk.f32.mxu0 %vm2773_vm3, %v2774_v0  ;;  %v1861_v0 = vld [vmem:[%s3284_s20] sm:$0xff] }
 0xaf4   :  { %v1598_v45 = vmul.f32 %v2432_v44, %v2428_v34  ;;  %v2369_v54 = vpack.c.bf16 %v1862_v53, %v1861_v0 }
 0xaf6   :  { %2249 = vmatmul.mubr.msk.f32.vlgmr.msra.gmra.mrb[18].mxu1 %vm1577_vm5, %v1598_v45  ;;  %2370 = vmatpush3.bf16.msra.mxu0 %v2369_v54 }
 0xaf7   :  { %2363 = vmatpush3.bf16.msra.mxu1 %v2360_v40  ;;  %2371 = vmatprep.subr.bf16.mxu0 %v2772_v63 }
 0xaf8   :  { %2365 = vmatprep.subr.bf16.mxu1 %v2364_v48 }
 0xafa   :  { %2373 = vmatpush3.bf16.msra.mxu0 %v2372_v57 }
 0xafb   :  { %2367 = vmatpush3.bf16.msra.mxu1 %v2364_v48 }
 0xbc5   :  { %v1748_v49 = vpop.f32.mrb[16].mxu0 }
 0xbc6   :  { %v2255_v50 = vpop.f32.mrb[17].mxu0 }
 0xbc9   :  { %v1672_v51 = vpop.f32.mrb[18].mxu1 }
 0xbca   :  { %v2250_v52 = vpop.f32.mrb[19].mxu1  ;;  %2264 = vmatprep.mubr.msk.f32.mxu1 %vm453_vm2, %v1672_v51 }
 0xbcb   :  { %2265 = vmatmul.mubr.msk.f32.vlgmr.msra.gmra.mrb[20].mxu1 %vm453_vm2, %v1748_v49 }
 0xc9e   :  { %v2266_v59 = vpop.f32.mrb[20].mxu1 }
 0xc9f   :  { %v1841_v60 = vadd.f32 %v2266_v59, %v2015_v58  ;;  %v1835_v61 = vpop.f32.mrb[21].mxu1 }
 0xca0   :  { %v1836_v62 = vadd.f32 %v2015_v58, %v1835_v61 }
 0xca1   :  { %v1851_v63 = vsel %vm453_vm2, %v1841_v60, 0.0 }
 0xca2   :  { %v1852_v1 = vrot.slane %v1851_v63, 4  ;;  %v1844_v2 = vsel %vm453_vm2, %v1836_v62, 0.0 }
 0xca3   :  { %v1845_v3 = vrot.slane %v1844_v2, 4 }
 0xca4   :  { %v1853_v4 = vadd.f32 %v1852_v1, %v1851_v63 }
 0xca5   :  { %v1846_v5 = vadd.f32 %v1845_v3, %v1844_v2 }
 0xca6   :  { %v1854_v6 = vrot.slane %v1853_v4, 2 }
 0xca7   :  { %v1847_v7 = vrot.slane %v1846_v5, 2 }
 0xca8   :  { %v1855_v8 = vadd.f32 %v1854_v6, %v1853_v4 }
 0xca9   :  { %v1848_v9 = vadd.f32 %v1847_v7, %v1846_v5 }
 0xcaa   :  { %v1856_v10 = vrot.slane %v1855_v8, 1 }
 0xcab   :  { %v1849_v11 = vrot.slane %v1848_v9, 1 }
 0xcac   :  { %v1857_v12 = vadd.f32 %v1856_v10, %v1855_v8 }
 0xcad   :  { %v1850_v13 = vadd.f32 %v1849_v11, %v1848_v9 }
 0xcae   :  { %v1860_v14 = vmul.f32 0.125, %v1857_v12 }
 0xcaf   :  { %v1859_v15 = vmul.f32 0.125, %v1850_v13 }
 0xcb1   :  { %v1875_v16 = vsel %vm1874_vm6, %v1860_v14, %v1859_v15 }
 0xcb2   :  { %2276 = vmatmul.mubr.msk.f32.vlgmr.msra.gmra.mrb[18].mxu0 %vm453_vm2, %v1875_v16 }
 0xd85   :  { %v1944_v18 = vpop.f32.mrb[18].mxu0 }
 0xd86   :  { %v1945_v19 = vadd.f32 %v2018_v17, %v1944_v18  ;;  %v2277_v20 = vpop.f32.mrb[19].mxu0 }
 0xd88   :  { %1949 = vst.msk [vmem:[#allocation23] sm:$0x3] %vm1948_vm7, %v1945_v19 }
 0xd89   :  { %2730 = shalt.err (!%p2727_p10)
}
 0xd8a   :  { %s2731_s28 = scalar_lea.hbm %s3286_s22, 32 }
 0xd8b   :  { %p2732_p11 = scmp.ne.s32.totalorder %s3286_s22, %s2731_s28  ;;  %p2735_p12 = scmp.lt.u32.totalorder %s2731_s28, %s3286_s22 }
 0xd8d   :  { %p2737_p13 = pnand %p2735_p12, %p2732_p11 }
 0xd8f   :  { %2740 = shalt.err (!%p2737_p13)
}
 0xd90   :  { %1959 = dma.vmem_to_hbm [thread:$0]  %s1957_s23, 32, %s3286_s22, [#allocation4]  }
 0xd91   :  { %2755 = dma.done.wait [#allocation4], 32  }
 0xd92   :  { %2756 = vsyncadd [#allocation4], 4294967264 }
 0xd93   :  { %1963 = vsyncpa [#allocation3], 1 }
 0xd94   :  { %1964 = vsyncpa [#allocation6], 1 }
 0xd95   :  { %1965 = vsyncpa [#allocation9], 1 }
 0xd96   :  { %1966 = vsyncpa [#allocation12], 1 }
 0xd97   :  { %1967 = vsyncpa [#allocation15], 1 }
 0xd98   :  { %1968 = vsyncpa [#allocation18], 1 }
 0xd99   :  { %1969 = vsyncpa [#allocation21], 1 }
 0xd9a   :  { %1970 = vsyncpa [#allocation4], 1 }

</bundles_post_ra>
